<compile_context>
chip_gen: v7x
topology: tpu7x:2x2x1
jax: 0.10.0
libtpu: 0.0.40
codegen_flags: <defaults>
</compile_context>

<pallas_src>
import math

import jax
import jax.numpy as jnp
from jax.experimental import pallas as pl
from jax.experimental.pallas import tpu as pltpu


# ----------------------------------------------------------------------------
# Pallas kernel: one program per batch element, all 4 orders fused.
# ----------------------------------------------------------------------------
def _rsnet_kernel(x1_ref, x2_ref, w1_ref, w2_ref, m_ref, diag_ref, a_ref,
                  bias_ref, o_ref):
    # x1_ref  : (N, F_in)          input1 for this batch (batch dim squeezed)
    # x2_ref  : (N, F_in)          input2 for this batch
    # w1_ref  : (2, F_in, 4*F_out) [W_even_all ; W_odd_all] packed lane-dense
    # w2_ref  : (F_in, 4*F_out)    W2 packed lane-dense
    # m_ref   : (N, 4*F_out)       M packed lane-dense
    # diag_ref: (N, 4*F_out)       diag(A_k) broadcast over F_out per order
    # a_ref   : (4, N, N)          A_k with zeroed diagonal
    # bias_ref: (1, 4*F_out)       bias (zeros when F_out == 3)
    # o_ref   : (N, 4*F_out)       output block for this batch
    f4 = m_ref.shape[-1]
    f_out = f4 // 4

    x1 = x1_ref[...]
    x2 = x2_ref[...]

    # Fused projections: 3 matmuls instead of 12 tiny ones, f32 accumulation.
    h_even = jnp.dot(x1, w1_ref[0], preferred_element_type=jnp.float32)
    h_odd = jnp.dot(x1, w1_ref[1], preferred_element_type=jnp.float32)
    xk = jnp.dot(x2, w2_ref[...], preferred_element_type=jnp.float32)

    m = m_ref[...]                                         # f32
    p_even = m * h_even                                    # (N, 4*F_out) f32
    p_odd = m * h_odd                                      # (N, 4*F_out) f32

    # Diagonal term of (A_k*I) @ (M_k*h_even) == row-scale by diag(A_k).
    acc = diag_ref[...] * p_even + xk + bias_ref[...]

    # Off-diagonal adjacency matmuls, one per order (A already has zero diag).
    a_dtype = a_ref.dtype
    parts = []
    for k in range(4):                                     # static unroll
        pk = p_odd[:, k * f_out:(k + 1) * f_out].astype(a_dtype)
        parts.append(jnp.dot(a_ref[k], pk,
                             preferred_element_type=jnp.float32))
    off = jnp.concatenate(parts, axis=1)                   # (N, 4*F_out)

    o_ref[...] = (acc + off).astype(o_ref.dtype)           # lane-dense store


# ----------------------------------------------------------------------------
# Wrapper: adjacency powers, weight packing, padding, pallas_call.
# ----------------------------------------------------------------------------
def rsnet_graph_conv(params, adj, input1, input2, *,
                     compute_dtype=jnp.float32):
    B, N, F_in = input1.shape
    F_out = params["W"].shape[-1]
    f4 = 4 * F_out

    # Adjacency powers + learnable perturbation, symmetrized (cheap glue).
    eye_n = jnp.eye(N, dtype=jnp.float32)
    adj_1 = adj.astype(jnp.float32)
    adj_2 = adj_1 @ adj_1
    adj_3 = adj_2 @ adj_1

    def sym(a_k, a2_k):
        s = a_k + a2_k
        return (s.T + s) * 0.5

    a_full = jnp.stack([
        sym(eye_n, params["adj2_0"]),
        sym(adj_1, params["adj2_1"]),
        sym(adj_2, params["adj2_2"]),
        sym(adj_3, params["adj2_3"]),
    ])                                                   # (4, N, N)

    diag_a = jnp.diagonal(a_full, axis1=1, axis2=2)      # (4, N)
    a_nodiag = a_full * (1.0 - eye_n)[None]              # zero the diagonal

    # Pack weights lane-dense: order k lives in column block k.
    w = params["W"]                                      # (8, F_in, F_out)
    w_even = jnp.concatenate([w[2 * k] for k in range(4)], axis=1)
    w_odd = jnp.concatenate([w[2 * k + 1] for k in range(4)], axis=1)
    w1_all = jnp.stack([w_even, w_odd])                  # (2, F_in, 4*F_out)
    w2_all = jnp.concatenate([params["W2"][k] for k in range(4)], axis=1)
    m_all = jnp.concatenate([params["M"][k] for k in range(4)], axis=1)
    diag_expand = jnp.concatenate(
        [jnp.broadcast_to(diag_a[k][:, None], (N, F_out)) for k in range(4)],
        axis=1)                                          # (N, 4*F_out)

    if F_out != 3:
        bias_row = params["bias"].reshape(1, f4).astype(jnp.float32)
    else:
        bias_row = jnp.zeros((1, f4), jnp.float32)

    # Pad N to a sublane multiple of 8; pad rows are inert (zero A/M/diag).
    N_pad = ((N + 7) // 8) * 8
    pad_n = N_pad - N
    if pad_n:
        input1_p = jnp.pad(input1, ((0, 0), (0, pad_n), (0, 0)))
        input2_p = jnp.pad(input2, ((0, 0), (0, pad_n), (0, 0)))
        m_all = jnp.pad(m_all, ((0, pad_n), (0, 0)))
        diag_expand = jnp.pad(diag_expand, ((0, pad_n), (0, 0)))
        a_nodiag = jnp.pad(a_nodiag, ((0, 0), (0, pad_n), (0, pad_n)))
    else:
        input1_p, input2_p = input1, input2

    # Matmul operands in compute_dtype (bf16 recommended on v5e/v6e/v7x);
    # elementwise path (M, diag, bias) and accumulation stay f32.
    x1c = input1_p.astype(compute_dtype)
    x2c = input2_p.astype(compute_dtype)
    w1c = w1_all.astype(compute_dtype)
    w2c = w2_all.astype(compute_dtype)
    ac = a_nodiag.astype(compute_dtype)
    m_all = m_all.astype(jnp.float32)
    diag_expand = diag_expand.astype(jnp.float32)

    out = pl.pallas_call(
        _rsnet_kernel,
        out_shape=jax.ShapeDtypeStruct((B, N_pad, f4), jnp.float32),
        grid_spec=pltpu.PrefetchScalarGridSpec(
            num_scalar_prefetch=0,
            grid=(B,),
            in_specs=[
                pl.BlockSpec((None, N_pad, F_in), lambda b: (b, 0, 0)),
                pl.BlockSpec((None, N_pad, F_in), lambda b: (b, 0, 0)),
                pl.BlockSpec((2, F_in, f4), lambda b: (0, 0, 0)),
                pl.BlockSpec((F_in, f4), lambda b: (0, 0)),
                pl.BlockSpec((N_pad, f4), lambda b: (0, 0)),
                pl.BlockSpec((N_pad, f4), lambda b: (0, 0)),
                pl.BlockSpec((4, N_pad, N_pad), lambda b: (0, 0, 0)),
                pl.BlockSpec((1, f4), lambda b: (0, 0)),
            ],
            out_specs=pl.BlockSpec((None, N_pad, f4), lambda b: (b, 0, 0)),
        ),
        compiler_params=pltpu.CompilerParams(
            dimension_semantics=("parallel",),
            vmem_limit_bytes=32 * 1024 * 1024),
    )(x1c, x2c, w1c, w2c, m_all, diag_expand, ac, bias_row)

    out = out[:, :N, :]                                  # drop pad rows

    if F_out != 3:
        # Already in torch.cat(dim=2) layout with bias added in-kernel.
        return out
    # F_out == 3: sum the four order blocks, then add bias_2.
    out_sum = out.reshape(B, N, 4, F_out).sum(axis=2)
    return out_sum + params["bias_2"].reshape(1, 1, -1)


# ----------------------------------------------------------------------------
# Deterministic parameter init (mirrors shapes from the PyTorch __init__).
# ----------------------------------------------------------------------------
def _xavier_uniform(key, shape, gain):
    receptive = 1
    for s in shape[2:]:
        receptive *= s
    fan_in = shape[1] * receptive
    fan_out = shape[0] * receptive
    bound = gain * math.sqrt(6.0 / (fan_in + fan_out))
    return jax.random.uniform(key, shape, jnp.float32, -bound, bound)


def init_params(key, in_features, out_features, n_nodes):
    k_w, k_w2, k_m, k_b, k_b2 = jax.random.split(key, 5)
    gain = 1.414
    stdv = 1.0 / math.sqrt(out_features)
    return {
        "W": _xavier_uniform(k_w, (8, in_features, out_features), gain),
        "W2": _xavier_uniform(k_w2, (4, in_features, out_features), gain),
        "M": _xavier_uniform(k_m, (4, n_nodes, out_features), gain),
        "adj2_0": jnp.full((n_nodes, n_nodes), 1e-6, jnp.float32),
        "adj2_1": jnp.full((n_nodes, n_nodes), 1e-6, jnp.float32),
        "adj2_2": jnp.full((n_nodes, n_nodes), 1e-6, jnp.float32),
        "adj2_3": jnp.full((n_nodes, n_nodes), 1e-6, jnp.float32),
        "bias": jax.random.uniform(k_b, (out_features * 4,), jnp.float32,
                                   -stdv, stdv),
        "bias_2": jax.random.uniform(k_b2, (out_features,), jnp.float32,
                                     -stdv, stdv),
    }


# ----------------------------------------------------------------------------
# Pure-JAX reference (mirrors the PyTorch forward) for correctness checks.
# ----------------------------------------------------------------------------
def rsnet_graph_conv_ref(params, adj, input1, input2):
    N = adj.shape[0]
    F_out = params["W"].shape[-1]
    eye_n = jnp.eye(N, dtype=jnp.float32)
    adjs = [eye_n, adj, adj @ adj, adj @ adj @ adj]
    outs = []
    for k in range(4):
        a = adjs[k] + params[f"adj2_{k}"]
        a_k = (a.T + a) * 0.5
        h_e = input1 @ params["W"][2 * k]
        h_o = input1 @ params["W"][2 * k + 1]
        xk = input2 @ params["W2"][k]
        outs.append((a_k * eye_n) @ (params["M"][k] * h_e)
                    + (a_k * (1.0 - eye_n)) @ (params["M"][k] * h_o) + xk)
    if F_out != 3:
        return jnp.concatenate(outs, axis=2) + params["bias"].reshape(1, 1, -1)
    return sum(outs) + params["bias_2"].reshape(1, 1, -1)


if __name__ == "__main__":
    B, N, F_in, F_out = 2, 8, 16, 32

    key = jax.random.PRNGKey(0)
    k_adj, k_x1, k_x2, k_p, k_p3 = jax.random.split(key, 5)

    # Deterministic symmetric adjacency (ring graph over N nodes).
    idx = jnp.arange(N)
    adj = (jnp.zeros((N, N), jnp.float32)
           .at[idx, (idx + 1) % N].set(1.0)
           .at[idx, (idx - 1) % N].set(1.0))

    params = init_params(k_p, F_in, F_out, N)
    input1 = jax.random.normal(k_x1, (B, N, F_in), jnp.float32)
    input2 = jax.random.normal(k_x2, (B, N, F_in), jnp.float32)

    ref = rsnet_graph_conv_ref(params, adj, input1, input2)

    # f32 path — tight check.
    out = jax.block_until_ready(
        rsnet_graph_conv(params, adj, input1, input2,
                         compute_dtype=jnp.float32))
    assert out.shape == (B, N, 4 * F_out), out.shape
    assert jnp.allclose(out, ref, atol=1e-4, rtol=1e-4), "f32 mismatch"

    # bf16-operand path (recommended on v5e/v6e/v7x) — loose sanity check
    # (operands rounded to bf16, accumulation in f32).
    out_bf16 = jax.block_until_ready(
        rsnet_graph_conv(params, adj, input1, input2,
                         compute_dtype=jnp.bfloat16))
    assert jnp.allclose(out_bf16, ref, atol=1.5e-1, rtol=1e-1), "bf16 mismatch"

    # F_out == 3 branch (sum of orders + bias_2), f32.
    params3 = init_params(k_p3, F_in, 3, N)
    out3 = jax.block_until_ready(
        rsnet_graph_conv(params3, adj, input1, input2,
                         compute_dtype=jnp.float32))
    ref3 = rsnet_graph_conv_ref(params3, adj, input1, input2)
    assert out3.shape == (B, N, 3), out3.shape
    assert jnp.allclose(out3, ref3, atol=1e-4, rtol=1e-4), "F_out=3 mismatch"

    print("KERNEL_OK")
</pallas_src>

<mosaic_0001>
module attributes {stable_mosaic.version = 11 : i64} {
  func.func @_rsnet_kernel(%arg0: i32, %arg1: memref<1x8x16xf32, #tpu.memory_space<vmem>>, %arg2: memref<1x8x16xf32, #tpu.memory_space<vmem>>, %arg3: memref<2x16x128xf32, #tpu.memory_space<vmem>>, %arg4: memref<16x128xf32, #tpu.memory_space<vmem>>, %arg5: memref<8x128xf32, #tpu.memory_space<vmem>>, %arg6: memref<8x128xf32, #tpu.memory_space<vmem>>, %arg7: memref<4x8x8xf32, #tpu.memory_space<vmem>>, %arg8: memref<1x128xf32, #tpu.memory_space<vmem>>, %arg9: memref<1x8x128xf32, #tpu.memory_space<vmem>>) attributes {dimension_semantics = [#tpu.dimension_semantics<parallel>], iteration_bounds = array<i64: 2>, scalar_prefetch = 0 : i64, scratch_operands = 0 : i64, tpu.core_type = #tpu.core_type<tc>, window_params = [{transform_indices = @transform_0, window_bounds = array<i64: 1, 8, 16>}, {transform_indices = @transform_1, window_bounds = array<i64: 1, 8, 16>}, {pipeline_mode = #tpu.pipeline_mode<synchronous>, transform_indices = @transform_2, window_bounds = array<i64: 2, 16, 128>}, {pipeline_mode = #tpu.pipeline_mode<synchronous>, transform_indices = @transform_3, window_bounds = array<i64: 16, 128>}, {pipeline_mode = #tpu.pipeline_mode<synchronous>, transform_indices = @transform_4, window_bounds = array<i64: 8, 128>}, {pipeline_mode = #tpu.pipeline_mode<synchronous>, transform_indices = @transform_5, window_bounds = array<i64: 8, 128>}, {pipeline_mode = #tpu.pipeline_mode<synchronous>, transform_indices = @transform_6, window_bounds = array<i64: 4, 8, 8>}, {pipeline_mode = #tpu.pipeline_mode<synchronous>, transform_indices = @transform_7, window_bounds = array<i64: 1, 128>}, {transform_indices = @transform_8, window_bounds = array<i64: 1, 8, 128>}]} {
    %c0 = arith.constant 0 : index
    %c0_0 = arith.constant 0 : index
    %c0_1 = arith.constant 0 : index
    %0 = vector.load %arg1[%c0, %c0_0, %c0_1] : memref<1x8x16xf32, #tpu.memory_space<vmem>>, vector<1x8x16xf32>
    %1 = vector.shape_cast %0 : vector<1x8x16xf32> to vector<8x16xf32>
    %c0_2 = arith.constant 0 : index
    %c0_3 = arith.constant 0 : index
    %c0_4 = arith.constant 0 : index
    %2 = vector.load %arg2[%c0_2, %c0_3, %c0_4] : memref<1x8x16xf32, #tpu.memory_space<vmem>>, vector<1x8x16xf32>
    %3 = vector.shape_cast %2 : vector<1x8x16xf32> to vector<8x16xf32>
    %c0_5 = arith.constant 0 : index
    %c0_6 = arith.constant 0 : index
    %c0_7 = arith.constant 0 : index
    %4 = vector.load %arg3[%c0_5, %c0_6, %c0_7] : memref<2x16x128xf32, #tpu.memory_space<vmem>>, vector<1x16x128xf32>
    %5 = vector.shape_cast %4 : vector<1x16x128xf32> to vector<16x128xf32>
    %cst = arith.constant dense<0.000000e+00> : vector<8x128xf32>
    %6 = tpu.matmul %1, %5, %cst {dimension_numbers = #tpu.dot_dimension_numbers<[1], [0], [0], [1], [0, 0, 1, 1], [], []>} : vector<8x16xf32>, vector<16x128xf32>, vector<8x128xf32> -> vector<8x128xf32>
    %c1 = arith.constant 1 : index
    %c0_8 = arith.constant 0 : index
    %c0_9 = arith.constant 0 : index
    %7 = vector.load %arg3[%c1, %c0_8, %c0_9] : memref<2x16x128xf32, #tpu.memory_space<vmem>>, vector<1x16x128xf32>
    %8 = vector.shape_cast %7 : vector<1x16x128xf32> to vector<16x128xf32>
    %cst_10 = arith.constant dense<0.000000e+00> : vector<8x128xf32>
    %9 = tpu.matmul %1, %8, %cst_10 {dimension_numbers = #tpu.dot_dimension_numbers<[1], [0], [0], [1], [0, 0, 1, 1], [], []>} : vector<8x16xf32>, vector<16x128xf32>, vector<8x128xf32> -> vector<8x128xf32>
    %c0_11 = arith.constant 0 : index
    %c0_12 = arith.constant 0 : index
    %10 = vector.load %arg4[%c0_11, %c0_12] : memref<16x128xf32, #tpu.memory_space<vmem>>, vector<16x128xf32>
    %cst_13 = arith.constant dense<0.000000e+00> : vector<8x128xf32>
    %11 = tpu.matmul %3, %10, %cst_13 {dimension_numbers = #tpu.dot_dimension_numbers<[1], [0], [0], [1], [0, 0, 1, 1], [], []>} : vector<8x16xf32>, vector<16x128xf32>, vector<8x128xf32> -> vector<8x128xf32>
    %c0_14 = arith.constant 0 : index
    %c0_15 = arith.constant 0 : index
    %12 = vector.load %arg5[%c0_14, %c0_15] : memref<8x128xf32, #tpu.memory_space<vmem>>, vector<8x128xf32>
    %13 = arith.mulf %12, %6 : vector<8x128xf32>
    %14 = arith.mulf %12, %9 : vector<8x128xf32>
    %c0_16 = arith.constant 0 : index
    %c0_17 = arith.constant 0 : index
    %15 = vector.load %arg6[%c0_16, %c0_17] : memref<8x128xf32, #tpu.memory_space<vmem>>, vector<8x128xf32>
    %16 = arith.mulf %15, %13 : vector<8x128xf32>
    %17 = arith.addf %16, %11 : vector<8x128xf32>
    %c0_18 = arith.constant 0 : index
    %c0_19 = arith.constant 0 : index
    %18 = vector.load %arg8[%c0_18, %c0_19] : memref<1x128xf32, #tpu.memory_space<vmem>>, vector<1x128xf32>
    %19 = vector.broadcast %18 : vector<1x128xf32> to vector<8x128xf32>
    %20 = arith.addf %17, %19 : vector<8x128xf32>
    %21 = vector.extract_strided_slice %14 {offsets = [0, 0], sizes = [8, 32], strides = [1, 1]} : vector<8x128xf32> to vector<8x32xf32>
    %c0_20 = arith.constant 0 : index
    %c0_21 = arith.constant 0 : index
    %c0_22 = arith.constant 0 : index
    %22 = vector.load %arg7[%c0_20, %c0_21, %c0_22] : memref<4x8x8xf32, #tpu.memory_space<vmem>>, vector<1x8x8xf32>
    %23 = vector.shape_cast %22 : vector<1x8x8xf32> to vector<8x8xf32>
    %cst_23 = arith.constant dense<0.000000e+00> : vector<8x32xf32>
    %24 = tpu.matmul %23, %21, %cst_23 {dimension_numbers = #tpu.dot_dimension_numbers<[1], [0], [0], [1], [0, 0, 1, 1], [], []>} : vector<8x8xf32>, vector<8x32xf32>, vector<8x32xf32> -> vector<8x32xf32>
    %25 = vector.extract_strided_slice %14 {offsets = [0, 32], sizes = [8, 32], strides = [1, 1]} : vector<8x128xf32> to vector<8x32xf32>
    %c1_24 = arith.constant 1 : index
    %c0_25 = arith.constant 0 : index
    %c0_26 = arith.constant 0 : index
    %26 = vector.load %arg7[%c1_24, %c0_25, %c0_26] : memref<4x8x8xf32, #tpu.memory_space<vmem>>, vector<1x8x8xf32>
    %27 = vector.shape_cast %26 : vector<1x8x8xf32> to vector<8x8xf32>
    %cst_27 = arith.constant dense<0.000000e+00> : vector<8x32xf32>
    %28 = tpu.matmul %27, %25, %cst_27 {dimension_numbers = #tpu.dot_dimension_numbers<[1], [0], [0], [1], [0, 0, 1, 1], [], []>} : vector<8x8xf32>, vector<8x32xf32>, vector<8x32xf32> -> vector<8x32xf32>
    %29 = vector.extract_strided_slice %14 {offsets = [0, 64], sizes = [8, 32], strides = [1, 1]} : vector<8x128xf32> to vector<8x32xf32>
    %c2 = arith.constant 2 : index
    %c0_28 = arith.constant 0 : index
    %c0_29 = arith.constant 0 : index
    %30 = vector.load %arg7[%c2, %c0_28, %c0_29] : memref<4x8x8xf32, #tpu.memory_space<vmem>>, vector<1x8x8xf32>
    %31 = vector.shape_cast %30 : vector<1x8x8xf32> to vector<8x8xf32>
    %cst_30 = arith.constant dense<0.000000e+00> : vector<8x32xf32>
    %32 = tpu.matmul %31, %29, %cst_30 {dimension_numbers = #tpu.dot_dimension_numbers<[1], [0], [0], [1], [0, 0, 1, 1], [], []>} : vector<8x8xf32>, vector<8x32xf32>, vector<8x32xf32> -> vector<8x32xf32>
    %33 = vector.extract_strided_slice %14 {offsets = [0, 96], sizes = [8, 32], strides = [1, 1]} : vector<8x128xf32> to vector<8x32xf32>
    %c3 = arith.constant 3 : index
    %c0_31 = arith.constant 0 : index
    %c0_32 = arith.constant 0 : index
    %34 = vector.load %arg7[%c3, %c0_31, %c0_32] : memref<4x8x8xf32, #tpu.memory_space<vmem>>, vector<1x8x8xf32>
    %35 = vector.shape_cast %34 : vector<1x8x8xf32> to vector<8x8xf32>
    %cst_33 = arith.constant dense<0.000000e+00> : vector<8x32xf32>
    %36 = tpu.matmul %35, %33, %cst_33 {dimension_numbers = #tpu.dot_dimension_numbers<[1], [0], [0], [1], [0, 0, 1, 1], [], []>} : vector<8x8xf32>, vector<8x32xf32>, vector<8x32xf32> -> vector<8x32xf32>
    %37 = tpu.concatenate %24, %28, %32, %36 in 1 : vector<8x32xf32>, vector<8x32xf32>, vector<8x32xf32>, vector<8x32xf32> -> vector<8x128xf32>
    %38 = arith.addf %20, %37 : vector<8x128xf32>
    %c0_34 = arith.constant 0 : index
    %c0_35 = arith.constant 0 : index
    %c0_36 = arith.constant 0 : index
    %39 = vector.load %arg9[%c0_34, %c0_35, %c0_36] : memref<1x8x128xf32, #tpu.memory_space<vmem>>, vector<1x8x128xf32>
    %40 = vector.shape_cast %39 : vector<1x8x128xf32> to vector<8x128xf32>
    %41 = vector.shape_cast %38 : vector<8x128xf32> to vector<1x8x128xf32>
    tpu.vector_store %arg9[%c0_34, %c0_35, %c0_36], %41 {strides = array<i32>} : memref<1x8x128xf32, #tpu.memory_space<vmem>>, vector<1x8x128xf32>,
    return
  }
  func.func @transform_0(%arg0: i32) -> (i32, i32, i32) {
    %c0_i32 = arith.constant 0 : i32
    %c0_i32_0 = arith.constant 0 : i32
    %c0_i32_1 = arith.constant 0 : i32
    return %arg0, %c0_i32, %c0_i32_0 : i32, i32, i32
  }
  func.func @transform_1(%arg0: i32) -> (i32, i32, i32) {
    %c0_i32 = arith.constant 0 : i32
    %c0_i32_0 = arith.constant 0 : i32
    %c0_i32_1 = arith.constant 0 : i32
    return %arg0, %c0_i32, %c0_i32_0 : i32, i32, i32
  }
  func.func @transform_2(%arg0: i32) -> (i32, i32, i32) {
    %c0_i32 = arith.constant 0 : i32
    %c0_i32_0 = arith.constant 0 : i32
    %c0_i32_1 = arith.constant 0 : i32
    %c0_i32_2 = arith.constant 0 : i32
    return %c0_i32, %c0_i32_0, %c0_i32_1 : i32, i32, i32
  }
  func.func @transform_3(%arg0: i32) -> (i32, i32) {
    %c0_i32 = arith.constant 0 : i32
    %c0_i32_0 = arith.constant 0 : i32
    %c0_i32_1 = arith.constant 0 : i32
    return %c0_i32, %c0_i32_0 : i32, i32
  }
  func.func @transform_4(%arg0: i32) -> (i32, i32) {
    %c0_i32 = arith.constant 0 : i32
    %c0_i32_0 = arith.constant 0 : i32
    %c0_i32_1 = arith.constant 0 : i32
    return %c0_i32, %c0_i32_0 : i32, i32
  }
  func.func @transform_5(%arg0: i32) -> (i32, i32) {
    %c0_i32 = arith.constant 0 : i32
    %c0_i32_0 = arith.constant 0 : i32
    %c0_i32_1 = arith.constant 0 : i32
    return %c0_i32, %c0_i32_0 : i32, i32
  }
  func.func @transform_6(%arg0: i32) -> (i32, i32, i32) {
    %c0_i32 = arith.constant 0 : i32
    %c0_i32_0 = arith.constant 0 : i32
    %c0_i32_1 = arith.constant 0 : i32
    %c0_i32_2 = arith.constant 0 : i32
    return %c0_i32, %c0_i32_0, %c0_i32_1 : i32, i32, i32
  }
  func.func @transform_7(%arg0: i32) -> (i32, i32) {
    %c0_i32 = arith.constant 0 : i32
    %c0_i32_0 = arith.constant 0 : i32
    %c0_i32_1 = arith.constant 0 : i32
    return %c0_i32, %c0_i32_0 : i32, i32
  }
  func.func @transform_8(%arg0: i32) -> (i32, i32, i32) {
    %c0_i32 = arith.constant 0 : i32
    %c0_i32_0 = arith.constant 0 : i32
    %c0_i32_1 = arith.constant 0 : i32
    return %arg0, %c0_i32, %c0_i32_0 : i32, i32, i32
  }
}

</mosaic_0001>

<bundles_post_ra>
// kernel: tpu_custom_call.1
= control target key start
LH: loop header
LB: loop body
LE: loop exit
PB: predicated region body
PF: predicated region fallthrough
CT: control target
= control target key end

     0   :  { %s1908_s0 = inlined_call_operand.hbm [shape: f32[2,8,16], index: 0, kind: input, shape index: {}]   ;;  %s1909_s1 = inlined_call_operand.hbm [shape: f32[2,8,16], index: 1, kind: input, shape index: {}]   ;;  %s1910_s2 = inlined_call_operand.hbm [shape: f32[2,16,128], index: 2, kind: input, shape index: {}]   ;;  %s1911_s3 = inlined_call_operand.hbm [shape: f32[16,128], index: 3, kind: input, shape index: {}]   ;;  %s1912_s4 = inlined_call_operand.vmem [shape: f32[8,128], index: 4, kind: input, shape index: {}]   ;;  %s1913_s5 = inlined_call_operand.vmem [shape: f32[8,128], index: 5, kind: input, shape index: {}]   ;;  %s1914_s6 = inlined_call_operand.hbm [shape: f32[4,8,8], index: 6, kind: input, shape index: {}]   ;;  %s1915_s7 = inlined_call_operand.vmem [shape: f32[1,128], index: 7, kind: input, shape index: {}]   ;;  %s1916_s8 = inlined_call_operand.hbm [shape: f32[2,8,128], index: 8, kind: output, shape index: {}]  }
   0x1   :  { %1923 = sst [smem:[#allocation19_spill]] %s1910_s2 }
   0x2   :  { %1924 = sst [smem:[#allocation20_spill]] %s1911_s3 }
   0x3   :  { %1925 = sst [smem:[#allocation21_spill]] %s1914_s6 }
   0x4   :  { %13 = vsyncpa [#allocation3], 0 }
   0x5   :  { %15 = vsyncpa [#allocation3 + $0x1], 0 }
   0x6   :  { %16 = vsyncpa [#allocation6], 0 }
   0x7   :  { %18 = vsyncpa [#allocation6 + $0x1], 0 }
   0x8   :  { %19 = vsyncpa [#allocation9], 0 }
   0x9   :  { %20 = vsyncpa [#allocation4], 0 }
   0xa   :  { %22 = vsyncpa [#allocation4 + $0x1], 0  ;;  %s1575_s27 = smov 0   ;;  %s1577_s28 = smov 0  }
   0xb   :  { %s1579_s29 = smov 0   ;;  %s1581_s30 = smov 0  }
   0xc LB: > { %1926 = sst [smem:[#allocation17_spill]] %s1502_s27  ;;  %s1596_s9 = sadd.s32 4294967295, %s1514_s30   ;;  %s1514_s30 = sphi %s1581_s30, %s1953_s30   ;;  %s1510_s29 = sphi %s1579_s29, %s1952_s29   ;;  %s1506_s28 = sphi %s1577_s28, %s1951_s28   ;;  %s1502_s27 = sphi %s1575_s27, %s1950_s27  }
   0xd   : > { %s1106_s10 = sadd.s32 4294967294, %s1514_s30   ;;  %p48_p0 = scmp.ne.s32.totalorder %s1506_s28, %s1502_s27 }
   0xe   : > { %p1917_p1 = scmp.eq.s32.totalorder %s1596_s9, 0  ;;  %p230_p3 = scmp.eq.s32.totalorder %s1106_s10, 1 }
   0xf   : > { %p1107_p5 = scmp.ge.s32.totalorder %s1514_s30, 1  ;;  %p237_p7 = scmp.lt.s32.totalorder %s1514_s30, 3 }
  0x10   : > { %p1605_p4 = por %p1917_p1, %p48_p0  ;;  %p1610_p6 = por %p230_p3, %p48_p0 }
  0x11   : > { %p1615_p8 = pnand %p1107_p5, %p237_p7  ;;  %s1516_s14 = smov [#allocation7]  }
  0x12   : > { %s1927_s11 = scalar_select %p1605_p4, 1, 0 }
  0x13   : > { %s1928_s12 = scalar_select %p1610_p6, 1, 0 }
  0x14   : > { %s1930_s13 = scalar_select %p1615_p8, 1, 0 }
  0x15   : > { %1929 = sst [smem:[#allocation18_spill]] %s1928_s12  ;;  %s249_s15 = sshll.u32 %s1516_s14, 4  ;;  %s1619_s15 = int_to_ptr.vmem [resolvable:$true] %s249_s15 }
  0x16   : > { %p1220_p9 = pneg %p1615_p8  ;;  %s1517_s17 = smov [#allocation8]  }
  0x17   : > { %s262_s18 = sshll.u32 %s1517_s17, 4  ;;  %s1518_s19 = smov [#allocation10]   ;;  %s1630_s18 = int_to_ptr.vmem [resolvable:$true] %s262_s18 }
  0x18   : > { %p1626_p11 = pnand %p1220_p9, %p1917_p1  ;;  %s1632_s20 = sshll.u32 %s1518_s19, 4  ;;  %s282_s20 = int_to_ptr.vmem [resolvable:$true] %s1632_s20 }
  0x19   : > { %s1932_s2 = sld [smem:[#allocation19_spill]] }
  0x1a   : > { %p1642_p13 = pneg %p1626_p11 }
  0x1f   : > { %s1292_s23 = scalar_lea.hbm %s1932_s2, 512 }
  0x20   : > { %p1293_p12 = scmp.ne.s32.totalorder %s1932_s2, %s1292_s23  ;;  %p1299_p5 = scmp.lt.u32.totalorder %s1292_s23, %s1932_s2 }
  0x22   : > { %p1295_p0 = pnand %p1642_p13, %p1293_p12 }
  0x24   : > { %p1296_p3 = pneg %p1295_p0 }
  0x26   : > { %p1301_p7 = pnand %p1299_p5, %p1296_p3 }
  0x28   : > { %1304 = shalt.err (!%p1301_p7)
}
  0x29   : > { %s1305_s17 = scalar_lea.vmem %s1619_s15, 512  ;;  %p1313_p2 = scmp.lt.s32.totalorder %s1619_s15, %s1619_s15 }
  0x2a   : > { %p1306_p9 = scmp.ne.s32.totalorder %s1619_s15, %s1305_s17  ;;  %p1314_p6 = scmp.lt.s32.totalorder %s1305_s17, %s1305_s17 }
  0x2c   : > { %p1308_p10 = pnand %p1306_p9, %p1642_p13  ;;  %p1315_p12 = por %p1314_p6, %p1313_p2 }
  0x2e   : > { %p1309_p1 = pneg %p1308_p10 }
  0x30   : > { %p1316_p0 = pnand %p1315_p12, %p1309_p1 }
  0x32   : > { %1319 = shalt.err (!%p1316_p0)
}
  0x33   : > { %s1519_s19 = smov 128   ;;  %s1520_s21 = smov 8  }
  0x34   : > { %1223 = dma.hbm_to_vmem [thread:$0]  (!%p1626_p11), %s1932_s2, 512, %s1619_s15, [#allocation6], %s1519_s19, %s1519_s19, %s1520_s21  }
  0x35   : > { %s1934_s3 = sld [smem:[#allocation20_spill]] }
  0x3b   : > { %s1320_s10 = scalar_lea.hbm %s1934_s3, 256 }
  0x3c   : > { %p1321_p1 = scmp.ne.s32.totalorder %s1934_s3, %s1320_s10  ;;  %p1327_p10 = scmp.lt.u32.totalorder %s1320_s10, %s1934_s3 }
  0x3e   : > { %p1323_p2 = pnand %p1321_p1, %p1642_p13 }
  0x40   : > { %p1324_p6 = pneg %p1323_p2 }
  0x42   : > { %p1329_p3 = pnand %p1327_p10, %p1324_p6 }
  0x44   : > { %1332 = shalt.err (!%p1329_p3)
}
  0x45   : > { %s1333_s15 = scalar_lea.vmem %s1630_s18, 256  ;;  %p1341_p12 = scmp.lt.s32.totalorder %s1630_s18, %s1630_s18 }
  0x46   : > { %p1334_p5 = scmp.ne.s32.totalorder %s1630_s18, %s1333_s15  ;;  %p1342_p0 = scmp.lt.s32.totalorder %s1333_s15, %s1333_s15 }
  0x48   : > { %p1336_p7 = pnand %p1334_p5, %p1642_p13  ;;  %p1343_p1 = por %p1342_p0, %p1341_p12 }
  0x4a   : > { %p1337_p9 = pneg %p1336_p7 }
  0x4c   : > { %p1344_p2 = pnand %p1343_p1, %p1337_p9 }
  0x4e   : > { %1347 = shalt.err (!%p1344_p2)
}
  0x4f   : > { %1226 = dma.hbm_to_vmem [thread:$0]  (!%p1626_p11), %s1934_s3, 256, %s1630_s18, [#allocation9], %s1519_s19, %s1519_s19, %s1520_s21  }
  0x50   : > { %s1935_s6 = sld [smem:[#allocation21_spill]] }
  0x56   : > { %s1348_s24 = scalar_lea.hbm %s1935_s6, 512 }
  0x57   : > { %p1349_p6 = scmp.ne.s32.totalorder %s1935_s6, %s1348_s24  ;;  %p1355_p5 = scmp.lt.u32.totalorder %s1348_s24, %s1935_s6 }
  0x59   : > { %p1351_p10 = pnand %p1349_p6, %p1642_p13 }
  0x5b   : > { %p1352_p3 = pneg %p1351_p10 }
  0x5d   : > { %p1357_p7 = pnand %p1355_p5, %p1352_p3 }
  0x5f   : > { %1360 = shalt.err (!%p1357_p7)
}
  0x60   : > { %s1361_s15 = scalar_lea.vmem %s282_s20, 512  ;;  %p1369_p1 = scmp.lt.s32.totalorder %s282_s20, %s282_s20 }
  0x61   : > { %p1362_p9 = scmp.ne.s32.totalorder %s282_s20, %s1361_s15  ;;  %p1370_p2 = scmp.lt.s32.totalorder %s1361_s15, %s1361_s15 }
  0x63   : > { %p1364_p12 = pnand %p1362_p9, %p1642_p13  ;;  %p1371_p4 = por %p1370_p2, %p1369_p1 }
  0x65   : > { %p1365_p0 = pneg %p1364_p12 }
  0x67   : > { %p1372_p8 = pnand %p1371_p4, %p1365_p0 }
  0x69   : > { %1375 = shalt.err (!%p1372_p8)
}
  0x6a   : > { %1229 = dma.hbm_to_vmem [thread:$0]  (!%p1626_p11), %s1935_s6, 512, %s282_s20, [#allocation9], %s1519_s19, %s1519_s19, %s1520_s21  }
  0x6b   : > { %s1715_s26 = sadd.s32 1, %s1514_s30   ;;  %s35_s12 = sadd.s32 1, %s1510_s29 }
  0x6c   : > { %s32_s16 = ssub.s32 %s1514_s30, %s1715_s26  ;;  %p42_p8 = scmp.ne.s32.totalorder %s1510_s29, %s1506_s28 }
  0x6d   : > { %p33_p4 = scmp.eq.s32.totalorder %s32_s16, 0  ;;  %p43_p13 = scmp.eq.s32.totalorder %s1514_s30, 0 }
  0x6e   : > { %p1244_p6 = scmp.lt.s32.totalorder %s1514_s30, 2  ;;  %p1936_p3 = scmp.eq.s32.totalorder %s1596_s9, 1 }
  0x6f   : > { %s1725_s22 = scalar_select %p33_p4, %s1510_s29, %s35_s12  }
  0x70   : > { %p44_p10 = por %p43_p13, %p42_p8  ;;  %p1729_p5 = por %p1936_p3, %p42_p8 }
  0x71   : > { %s298_s24 = sand.u32 1, %s1510_s29   ;;  %s1113_s25 = sshll.u32 %s1514_s30, 7 }
  0x72   : > { %s1937_s23 = scalar_select %p1729_p5, 1, 0 }
  0x73   : > { %s1735_s20 = sshll.u32 %s298_s24, 3  ;;  %s1740_s10 = scalar_lea.hbm %s1908_s0, %s1113_s25 }
  0x74   : > { %s302_s14 = scalar_lea.vmem [#allocation2], %s1735_s20  ;;  %p1743_p11 = pnand %p1244_p6, %p44_p10 }
  0x75   : > { %s309_s17 = sshll.u32 %s302_s14, 4  ;;  %s1752_s16 = scalar_lea.hbm %s1909_s1, %s1113_s25  ;;  %s1747_s17 = int_to_ptr.vmem [resolvable:$true] %s309_s17 }
  0x76   : > { %s299_s12 = scalar_lea.sflag [#allocation3], %s298_s24  ;;  %s1376_s19 = scalar_lea.hbm %s1740_s10, 128 }
  0x77   : > { %p1377_p7 = scmp.ne.s32.totalorder %s1740_s10, %s1376_s19  ;;  %p1378_p9 = pneg %p1743_p11 }
  0x78   : > { %s1381_s2 = scalar_lea.hbm %s1908_s0, 256  ;;  %p1382_p1 = scmp.lt.u32.totalorder %s1740_s10, %s1908_s0 }
  0x79   : > { %p1379_p12 = pnand %p1378_p9, %p1377_p7  ;;  %p1383_p2 = scmp.lt.u32.totalorder %s1381_s2, %s1376_s19 }
  0x7a   : > { %p1385_p8 = scmp.lt.u32.totalorder %s1376_s19, %s1740_s10 }
  0x7b   : > { %p1380_p0 = pneg %p1379_p12  ;;  %p1384_p4 = por %p1383_p2, %p1382_p1 }
  0x7d   : > { %p1386_p13 = por %p1385_p8, %p1384_p4 }
  0x7f   : > { %p1387_p6 = pnand %p1386_p13, %p1380_p0 }
  0x81   : > { %1390 = shalt.err (!%p1387_p6)
}
  0x82   : > { %s1391_s24 = scalar_lea.vmem %s1747_s17, 128  ;;  %s1521_s25 = smov [#allocation2]  }
  0x83   : > { %p1392_p10 = scmp.ne.s32.totalorder %s1747_s17, %s1391_s24  ;;  %s1396_s18 = sshll.u32 %s1521_s25, 4  ;;  %s1397_s18 = int_to_ptr.vmem [resolvable:$false] %s1396_s18 }
  0x84   : > { %s1398_s3 = scalar_lea.vmem %s1397_s18, 256  ;;  %p1399_p12 = scmp.lt.s32.totalorder %s1747_s17, %s1397_s18 }
  0x85   : > { %p1394_p3 = pnand %p1392_p10, %p1378_p9  ;;  %p1400_p1 = scmp.lt.s32.totalorder %s1398_s3, %s1391_s24 }
  0x87   : > { %p1395_p7 = pneg %p1394_p3  ;;  %p1401_p2 = por %p1400_p1, %p1399_p12 }
  0x89   : > { %p1402_p4 = pnand %p1401_p2, %p1395_p7 }
  0x8b   : > { %1405 = shalt.err (!%p1402_p4)
}
  0x8c   : > { %1233 = dma.hbm_to_vmem [thread:$0]  (!%p1743_p11), %s1740_s10, 128, %s1747_s17, %s299_s12  }
  0x8d   : > { %s316_s2 = sand.u32 1, %s1514_s30   ;;  %s320_s6 = scalar_lea.vmem [#allocation5], %s1735_s20 }
  0x8e   : > { %s327_s27 = sshll.u32 %s320_s6, 4  ;;  %s317_s19 = scalar_lea.sflag [#allocation6], %s316_s2  ;;  %s328_s27 = int_to_ptr.vmem [resolvable:$true] %s327_s27 }
  0x8f   : > { %s1406_s21 = scalar_lea.hbm %s1752_s16, 128  ;;  %s1411_s25 = scalar_lea.hbm %s1909_s1, 256 }
  0x90   : > { %p1407_p0 = scmp.ne.s32.totalorder %s1752_s16, %s1406_s21  ;;  %p1412_p6 = scmp.lt.u32.totalorder %s1752_s16, %s1909_s1 }
  0x91   : > { %p1413_p10 = scmp.lt.u32.totalorder %s1411_s25, %s1406_s21  ;;  %p1415_p7 = scmp.lt.u32.totalorder %s1406_s21, %s1752_s16 }
  0x92   : > { %p1409_p8 = pnand %p1407_p0, %p1378_p9 }
  0x93   : > { %p1414_p3 = por %p1413_p10, %p1412_p6 }
  0x94   : > { %p1410_p13 = pneg %p1409_p8 }
  0x95   : > { %p1416_p12 = por %p1415_p7, %p1414_p3 }
  0x97   : > { %p1417_p1 = pnand %p1416_p12, %p1410_p13 }
  0x99   : > { %1420 = shalt.err (!%p1417_p1)
}
  0x9a   : > { %s1421_s20 = scalar_lea.vmem %s328_s27, 128  ;;  %s1522_s10 = smov [#allocation5]  }
  0x9b   : > { %p1422_p2 = scmp.ne.s32.totalorder %s328_s27, %s1421_s20  ;;  %s1426_s17 = sshll.u32 %s1522_s10, 4  ;;  %s1427_s17 = int_to_ptr.vmem [resolvable:$false] %s1426_s17 }
  0x9c   : > { %s1428_s12 = scalar_lea.vmem %s1427_s17, 256  ;;  %p1429_p8 = scmp.lt.s32.totalorder %s328_s27, %s1427_s17 }
  0x9d   : > { %p1424_p4 = pnand %p1422_p2, %p1378_p9  ;;  %p1430_p5 = scmp.lt.s32.totalorder %s1428_s12, %s1421_s20 }
  0x9f   : > { %p1425_p0 = pneg %p1424_p4  ;;  %p1431_p6 = por %p1430_p5, %p1429_p8 }
  0xa1   : > { %p1432_p10 = pnand %p1431_p6, %p1425_p0 }
  0xa3   : > { %1435 = shalt.err (!%p1432_p10)
}
  0xa4   : > { %1236 = dma.hbm_to_vmem [thread:$0]  (!%p1743_p11), %s1752_s16, 128, %s328_s27, %s317_s19  }
  0xa5   : > { %p1939_p13 = scmp.ne.s32.totalorder %s1930_s13, 0 }
  0xa6   : > { %s1803_s2 = sand.u32 (!%p1939_p13), 1, %s1506_s28   ;;  %p1940_p5 = scmp.ne.s32.totalorder (!%p1939_p13), %s1927_s11, 0 }
  0xa7   : > { %336 = sbr.rel (%p1939_p13) target bundleno = 870 (0x366), region = 52  ;;  %s1806_s6 = sshll.u32 (!%p1939_p13), %s1803_s2, 3 }
  0xa8   : > { %s339_s21 = scalar_lea.sflag (!%p1939_p13), [#allocation3], %s1803_s2  ;;  %s342_s14 = scalar_lea.vmem (!%p1939_p13), [#allocation2], %s1806_s6 }
  0xae   : > { %1481 = dma.done.wait (%p1940_p5), %s339_s21, 128  }
  0xaf   : > { %1483 = vsyncadd (%p1940_p5), %s339_s21, 4294967168  ;;  %s347_s13 = sand.u32 1, %s1596_s9   ;;  %s351_s16 = scalar_lea.vmem [#allocation5], %s1806_s6 }
  0xb0   : > { %s348_s15 = scalar_lea.sflag [#allocation6], %s347_s13 }
  0xb1   : > { %1485 = dma.done.wait (%p1940_p5), %s348_s15, 128  }
  0xb2   : > { %1487 = vsyncadd (%p1940_p5), %s348_s15, 4294967168  ;;  %p1941_p11 = scmp.eq.s32.totalorder %s1596_s9, 0 }
  0xb4   : > { %1489 = dma.done.wait (%p1941_p11), [#allocation6], 512   ;;  %p1942_p9 = pmov %p1941_p11 }
  0xb6   : > { %1491 = vsyncadd (%p1942_p9), [#allocation6], 4294966784  ;;  %p1943_p3 = pmov %p1942_p9 }
  0xb8   : > { %1493 = dma.done.wait (%p1943_p3), [#allocation9], 768   ;;  %p1944_p7 = pmov %p1943_p3 }
  0xb9   : > { %v1523_v0 = vmov 0.0|0.0   ;;  %vm1524_vm0 = vmmov 0   ;;  %v1525_v1 = vmov 0.0   ;;  %v480_v2 = vld [vmem:[#allocation7 + $0x10] sm:$0xff]  ;;  %v481_v3 = vld [vmem:[#allocation7 + $0x18] sm:$0xff]  ;;  %v401_v5 = vld [vmem:[%s342_s14] sm:$0xff] }
  0xba   : > { %1495 = vsyncadd (%p1944_p7), [#allocation9], 4294966528  ;;  %1196 = vmatprep.subr.bf16.mxu1 %v1523_v0  ;;  %1163 = vmatprep.mubr.msk.f32.mxu1 %vm1524_vm0, %v1525_v1  ;;  %v1197_v4 = vpack.c.bf16 %v481_v3, %v480_v2  ;;  %vm405_vm1 = vcmask 130048   ;;  %v403_v6 = vld [vmem:[#allocation7] sm:$0xff]  ;;  %v404_v7 = vld [vmem:[#allocation7 + $0x8] sm:$0xff]  ;;  %vm642_vm2 = vcmask 64512  }
  0xbb   : > { %1193 = vmatprep.subr.bf16.mxu0 %v1523_v0  ;;  %1156 = vmatprep.mubr.msk.f32.mxu0 %vm1524_vm0, %v1525_v1  ;;  %v552_v8 = vld [vmem:[#allocation8] sm:$0xff]  ;;  %v1194_v9 = vpack.c.bf16 %v404_v7, %v403_v6  ;;  %v553_v10 = vld [vmem:[#allocation8 + $0x8] sm:$0xff]  ;;  %v402_v12 = vld [vmem:[%s351_s16] sm:$0xff]  ;;  %s1526_s19 = smov 32   ;;  %s1527_s24 = smov 96   ;;  %vm963_vm3 = vcmask 261120  }
  0xbc   : > { %1198 = vmatpush3.bf16.msra.mxu1 %v1197_v4  ;;  %v1200_v11 = vpack.c.bf16 %v553_v10, %v552_v8  ;;  %v627_v13 = vld [vmem:[%s1912_s4] sm:$0xff]  ;;  %v641_v17 = vld [vmem:[#allocation10] sm:$0xff]  ;;  %s1528_s25 = smov 64   ;;  %v717_v26 = vld [vmem:[#allocation10 + $0x8] sm:$0xff]  ;;  %vm965_vm4 = vcmask 523264   ;;  %vm967_vm5 = vcmask 785408  }
  0xbd   : > { %1173 = vmatprep.subr.mxu1 %v1525_v1  ;;  %1195 = vmatpush3.bf16.msra.mxu0 %v1194_v9  ;;  %v630_v19 = vld [vmem:[%s1913_s5] sm:$0xff]  ;;  %v874_v30 = vld [vmem:[#allocation10 + $0x18] sm:$0xff]  ;;  %s1132_s17 = sshll.u32 %s1596_s9, 7  ;;  %s400_s12 = scalar_lea.vmem [#allocation11], %s1806_s6 }
  0xbe   : > { %1199 = vmatprep.subr.bf16.mxu0 %v1523_v0  ;;  %v796_v29 = vld [vmem:[#allocation10 + $0x10] sm:$0xff]  ;;  %s985_s21 = sshll.u32 %s400_s12, 4  ;;  %s1864_s15 = scalar_lea.hbm %s1916_s8, %s1132_s17  ;;  %s1866_s21 = int_to_ptr.vmem [resolvable:$true] %s985_s21 }
  0xbf   : > { %1164 = vmatmul.mubr.msk.f32.vlgmr.msra.gmra.mrb[0].mxu1 %vm405_vm1, %v401_v5  ;;  %v1126_v41 = vld [vmem:[%s1915_s7] ss:$0 sm:$0xff]  ;;  %s972_s16 = scalar_lea.sflag [#allocation4], %s1803_s2  ;;  %s1436_s11 = scalar_lea.vmem %s1866_s21, 128 }
  0xc0   : > { %1175 = vmatprep.mubr.msk.f32.mxu1 %vm1524_vm0, %v1525_v1  ;;  %1157 = vmatmul.mubr.msk.f32.vlgmr.msra.gmra.mrb[0].mxu0 %vm405_vm1, %v401_v5  ;;  %p1437_p12 = scmp.ne.s32.totalorder %s1866_s21, %s1436_s11  ;;  %p1945_p1 = scmp.ne.s32.totalorder %s1937_s23, 0 }
  0xc1   : > { %1201 = vmatpush3.bf16.msra.mxu0 %v1200_v11  ;;  %1170 = vmatprep.mubr.msk.f32.mxu0 %vm1524_vm0, %v1525_v1  ;;  %s1529_s9 = smov [#allocation11]  }
  0xc2   : > { %1178 = vmatprep.subr.mxu0 %v1525_v1  ;;  %p1438_p2 = pnand %p1437_p12, %p1945_p1  ;;  %s1440_s6 = sshll.u32 %s1529_s9, 4  ;;  %s1441_s6 = int_to_ptr.vmem [resolvable:$false] %s1440_s6 }
  0xc3   : > { %s1442_s27 = scalar_lea.vmem %s1441_s6, 256  ;;  %p1443_p0 = scmp.lt.s32.totalorder %s1866_s21, %s1441_s6 }
  0xc4   : > { %1171 = vmatmul.mubr.msk.f32.vlgmr.msra.gmra.mrb[2].mxu0 %vm405_vm1, %v402_v12  ;;  %p1439_p4 = pneg %p1438_p2  ;;  %p1444_p8 = scmp.lt.s32.totalorder %s1442_s27, %s1436_s11 }
  0xc5   : > { %1180 = vmatprep.mubr.msk.f32.mxu0 %vm1524_vm0, %v1525_v1 }
  0xc6   : > { %p1445_p6 = por %p1444_p8, %p1443_p0 }
  0xc8   : > { %p1446_p10 = pnand %p1445_p6, %p1439_p4 }
 0x192   : > { %v548_v14 = vpop.f32.mrb[0].mxu1 }
 0x193   : > { %v629_v15 = vmul.f32 %v627_v13, %v548_v14  ;;  %v1165_v16 = vpop.f32.mrb[1].mxu1  ;;  %v475_v18 = vpop.f32.mrb[0].mxu0 }
 0x194   : > { %v628_v20 = vmul.f32 %v627_v13, %v475_v18  ;;  %v1158_v21 = vpop.f32.mrb[1].mxu0 }
 0x195   : > { %875 = vrot.lane.b32.xlu1 %v629_v15, %s1526_s19  ;;  %719 = vrot.lane.b32.xlu0 %v629_v15, %s1527_s24 }
 0x196   : > { %1174 = vmatpush3.msra.mxu1 %v629_v15  ;;  %v631_v22 = vmul.f32 %v630_v19, %v628_v20 }
 0x197   : > { %1176 = vmatmul.mubr.msk.f32.vlgmr.msra.gmra.mrb[2].mxu1 %vm642_vm2, %v641_v17  ;;  %1183 = vmatprep.subr.mxu1 %v1525_v1  ;;  %v623_v23 = vpop.f32.mrb[2].mxu0 }
 0x198   : > { %1185 = vmatprep.mubr.msk.f32.mxu1 %vm1524_vm0, %v1525_v1  ;;  %v632_v24 = vadd.f32 %v631_v22, %v623_v23  ;;  %v1172_v25 = vpop.f32.mrb[3].mxu0 }
 0x199   : > { %797 = vrot.lane.b32.xlu0 %v629_v15, %s1528_s25 }
 0x19a   : > { %v640_v45 = vadd.f32 %v1126_v41, %v632_v24 }
 0x207   : > { %v720_v27 = vpop.permute.xlu0 %719  ;;  %v876_v28 = vpop.permute.xlu1 %875 }
 0x208   : > { %1179 = vmatpush3.msra.mxu0 %v720_v27 }
 0x209   : > { %1181 = vmatmul.mubr.msk.f32.vlgmr.msra.gmra.mrb[4].mxu0 %vm642_vm2, %v717_v26  ;;  %1188 = vmatprep.subr.mxu0 %v1525_v1 }
 0x20a   : > { %1189 = vmatpush3.msra.mxu0 %v876_v28  ;;  %1190 = vmatprep.mubr.msk.f32.mxu0 %vm1524_vm0, %v1525_v1 }
 0x20b   : > { %v798_v31 = vpop.permute.xlu0 %797 }
 0x20c   : > { %1184 = vmatpush3.msra.mxu1 %v798_v31 }
 0x20d   : > { %1186 = vmatmul.mubr.msk.f32.vlgmr.msra.gmra.mrb[4].mxu1 %vm642_vm2, %v796_v29  ;;  %1191 = vmatmul.mubr.msk.f32.vlgmr.msra.gmra.mrb[6].mxu0 %vm642_vm2, %v874_v30 }
 0x26a   : > { %v712_v32 = vpop.f32.mrb[2].mxu1 }
 0x26b   : > { %v1177_v33 = vpop.f32.mrb[3].mxu1 }
 0x2dc   : > { %v791_v34 = vpop.f32.mrb[4].mxu0 }
 0x2dd   : > { %952 = vrot.lane.b32.xlu1 %v791_v34, %s1526_s19  ;;  %v1182_v35 = vpop.f32.mrb[5].mxu0 }
 0x2e0   : > { %v869_v36 = vpop.f32.mrb[4].mxu1  ;;  %v947_v37 = vpop.f32.mrb[6].mxu0 }
 0x2e1   : > { %956 = vrot.lane.b32.xlu0 %v869_v36, %s1528_s25  ;;  %960 = vrot.lane.b32.xlu1 %v947_v37, %s1527_s24  ;;  %v1187_v38 = vpop.f32.mrb[5].mxu1  ;;  %v1192_v39 = vpop.f32.mrb[7].mxu0 }
 0x34f   : > { %v953_v40 = vpop.permute.xlu1 %952 }
 0x350   : > { %v964_v42 = vsel %vm963_vm3, %v712_v32, %v953_v40 }
 0x353   : > { %v957_v43 = vpop.permute.xlu0 %956  ;;  %v961_v44 = vpop.permute.xlu1 %960 }
 0x354   : > { %v966_v46 = vsel %vm965_vm4, %v964_v42, %v957_v43 }
 0x355   : > { %v968_v47 = vsel %vm967_vm5, %v966_v46, %v961_v44 }
 0x356   : > { %v969_v48 = vadd.f32 %v968_v47, %v640_v45 }
 0x358   : > { %970 = vst [vmem:[%s400_s12] sm:$0xff] %v969_v48 }
 0x359   : > { %1449 = shalt.err (!%p1446_p10)
}
 0x35a   : > { %s1450_s2 = scalar_lea.hbm %s1864_s15, 128  ;;  %s1454_s25 = scalar_lea.hbm %s1916_s8, 256 }
 0x35b   : > { %p1451_p13 = scmp.ne.s32.totalorder %s1864_s15, %s1450_s2  ;;  %p1455_p9 = scmp.lt.u32.totalorder %s1864_s15, %s1916_s8 }
 0x35c   : > { %p1456_p3 = scmp.lt.u32.totalorder %s1454_s25, %s1450_s2  ;;  %p1458_p12 = scmp.lt.u32.totalorder %s1450_s2, %s1864_s15 }
 0x35d   : > { %p1452_p5 = pnand %p1451_p13, %p1945_p1 }
 0x35e   : > { %p1457_p7 = por %p1456_p3, %p1455_p9 }
 0x35f   : > { %p1453_p11 = pneg %p1452_p5 }
 0x360   : > { %p1459_p2 = por %p1458_p12, %p1457_p7 }
 0x362   : > { %p1460_p4 = pnand %p1459_p2, %p1453_p11 }
 0x364   : > { %1463 = shalt.err (!%p1460_p4)
}
 0x365   : > { %1218 = dma.vmem_to_hbm [thread:$0]  (%p1945_p1), %s1866_s21, 128, %s1864_s15, %s972_s16  }
 0x366 PF: > { %s1946_s20 = sld [smem:[#allocation17_spill]]  ;;  %s1947_s10 = sld [smem:[#allocation18_spill]] }
 0x367   : > { %p1949_p8 = scmp.ge.s32.totalorder %s1514_s30, 2 }
 0x36c   : > { %s997_s17 = sand.u32 1, %s1946_s20   ;;  %p1948_p0 = scmp.ne.s32.totalorder %s1947_s10, 0 }
 0x36d   : > { %s998_s12 = scalar_lea.sflag [#allocation4], %s997_s17 }
 0x36e   : > { %p1238_p6 = pnand %p1949_p8, %p1948_p0 }
 0x370   : > { %1497 = dma.done.wait (!%p1238_p6), %s998_s12, 128  }
 0x371   : > { %1499 = vsyncadd (!%p1238_p6), %s998_s12, 4294967168  ;;  %p25_p10 = scmp.ge.s32.totalorder %s1715_s26, 4   ;;  %s1950_s27 = smov %s1506_s28 }
 0x372   : > { %s1951_s28 = smov %s1510_s29  ;;  %s1952_s29 = smov %s1725_s22 }
 0x373   : > { %s1953_s30 = smov %s1715_s26  ;;  %27 = sbr.rel (!%p25_p10) target bundleno = 12 (0xc), region = 126 }
 0x37a   :  { %1003 = vsyncpa [#allocation3], 1 }
 0x37b   :  { %1005 = vsyncpa [#allocation3 + $0x1], 1 }
 0x37c   :  { %1006 = vsyncpa [#allocation6], 1 }
 0x37d   :  { %1008 = vsyncpa [#allocation6 + $0x1], 1 }
 0x37e   :  { %1009 = vsyncpa [#allocation9], 1 }
 0x37f   :  { %1010 = vsyncpa [#allocation4], 1 }
 0x380   :  { %1012 = vsyncpa [#allocation4 + $0x1], 1 }

</bundles_post_ra>
